<compile_context>
chip_gen: v5e
topology: v5e:2x2
jax: 0.10.0
libtpu: 0.0.40
codegen_flags: <defaults>
</compile_context>

<pallas_src>
import jax
import jax.numpy as jnp
from jax.experimental import pallas as pl
from jax.experimental.pallas import tpu as pltpu

_LANE = 128
_SUBLANE = 8


def _round_up(x, m):
    return ((x + m - 1) // m) * m


def _cdiv(a, b):
    return -(-a // b)


def _choose_tiling(B, L):
    """Pick (TB, nB, B_pad, TL, nL, L_pad) for lane-dense [B, L] blocking."""
    budget = (2 << 20) // 4  # ~2 MiB of f32 elements per stream per block

    # Lane-axis chunking (reduction axis): full row if it fits, else chunk.
    tl_cap = max(_LANE, (budget // _SUBLANE) // _LANE * _LANE)
    if L <= tl_cap:
        TL, nL = _round_up(L, _LANE), 1
    else:
        nL = _cdiv(L, tl_cap)
        TL = _round_up(_cdiv(L, nL), _LANE)
    L_pad = TL * nL

    # Batch rows per step: as many as fit the per-stream budget.
    tb_cap = max(1, budget // TL)
    if B <= tb_cap:
        TB, nB, B_pad = B, 1, B  # block first dim == full dim -> always legal
    else:
        TB = max(_SUBLANE, (tb_cap // _SUBLANE) * _SUBLANE)
        nB = _cdiv(B, TB)
        B_pad = TB * nB
    return TB, nB, B_pad, TL, nL, L_pad


def _masked_mse_kernel(land_ref, out_ref, tgt_ref, stn_ref, sesum_ref, cnt_ref):
    # land_ref: (1, TL) f32 in {0,1}   -- pre-binarized land/sea mask chunk
    # out_ref/tgt_ref/stn_ref: (TB, TL) -- current batch-rows x spatial-chunk
    # sesum_ref/cnt_ref: (TB, 1) f32   -- resident accumulators across axis 1
    @pl.when(pl.program_id(1) == 0)
    def _():
        sesum_ref[...] = jnp.zeros_like(sesum_ref)
        cnt_ref[...] = jnp.zeros_like(cnt_ref)

    o = out_ref[...].astype(jnp.float32)
    t = tgt_ref[...].astype(jnp.float32)
    stn_is_zero = stn_ref[...] == 0
    valid = jnp.where(stn_is_zero, land_ref[...], 0.0)  # (TB, TL) in {0,1}
    diff = o - t
    sesum_ref[...] += jnp.sum(diff * diff * valid, axis=-1, keepdims=True)
    cnt_ref[...] += jnp.sum(valid, axis=-1, keepdims=True)


def _per_sample_sums(land_row, output, target, station):
    B, C, H, W = output.shape
    assert C == 1
    L = H * W
    TB, nB, B_pad, TL, nL, L_pad = _choose_tiling(B, L)

    def prep(x):
        x = x.reshape(B, L)
        if B_pad != B or L_pad != L:
            x = jnp.pad(x, ((0, B_pad - B), (0, L_pad - L)))
        return x

    out2, tgt2, stn2 = prep(output), prep(target), prep(station)
    land = land_row
    if L_pad != L:
        land = jnp.pad(land, ((0, 0), (0, L_pad - L)))  # pad with 0 -> invalid

    grid = (nB, nL)
    in_specs = [
        pl.BlockSpec((1, TL), lambda b, l: (0, l)),    # land mask (shared)
        pl.BlockSpec((TB, TL), lambda b, l: (b, l)),   # output
        pl.BlockSpec((TB, TL), lambda b, l: (b, l)),   # target
        pl.BlockSpec((TB, TL), lambda b, l: (b, l)),   # station mask
    ]
    out_specs = [
        pl.BlockSpec((TB, 1), lambda b, l: (b, 0)),    # per-sample SE sum
        pl.BlockSpec((TB, 1), lambda b, l: (b, 0)),    # per-sample valid count
    ]
    out_shape = (
        jax.ShapeDtypeStruct((B_pad, 1), jnp.float32),
        jax.ShapeDtypeStruct((B_pad, 1), jnp.float32),
    )

    se_sum, cnt = pl.pallas_call(
        _masked_mse_kernel,
        grid=grid,
        in_specs=in_specs,
        out_specs=out_specs,
        out_shape=out_shape,
        compiler_params=pltpu.CompilerParams(
            dimension_semantics=("parallel", "arbitrary")),
    )(land, out2, tgt2, stn2)

    return se_sum[:B, 0], cnt[:B, 0]


class MaskedMSELoss:
    """JAX/Pallas port of the PyTorch MaskedMSELoss module."""

    def __init__(self, mask_2d):
        mask = jnp.asarray(mask_2d, dtype=jnp.float32)  # [H, W]
        assert mask.ndim == 2
        self._hw = mask.shape
        # Pre-binarized land mask, flattened lane-dense: (1, H*W) in {0, 1}.
        self._land_row = (mask == 1.0).astype(jnp.float32).reshape(1, -1)

    def __call__(self, output, target, station_mask, reduction="mean"):
        assert reduction in ("none", "mean", "global")
        output = jnp.asarray(output)
        target = jnp.asarray(target)
        station = jnp.asarray(station_mask)
        if station.dtype == jnp.bool_:
            station = station.astype(jnp.int8)  # keep traffic low, safe lowering
        B, C, H, W = output.shape
        assert C == 1 and (H, W) == self._hw

        se_sum, cnt = _per_sample_sums(self._land_row, output, target, station)
        valid_counts = jnp.maximum(cnt, 1.0)
        mse_per_sample = se_sum / valid_counts
        if reduction == "none":
            return mse_per_sample
        if reduction == "mean":
            return jnp.mean(mse_per_sample)
        # 'global': matches PyTorch module exactly (sum of *clamped* counts,
        # clamped again).
        total_se = jnp.sum(se_sum)
        total_valid = jnp.maximum(jnp.sum(valid_counts), 1.0)
        return total_se / total_valid


def _reference(mask_2d, output, target, station_mask, reduction):
    B = output.shape[0]
    mask = mask_2d[None, None, :, :]
    valid = jnp.logical_and(mask == 1.0,
                            station_mask.astype(jnp.float32) == 0.0
                            ).astype(jnp.float32)
    se = (output.astype(jnp.float32) - target.astype(jnp.float32)) ** 2
    masked_se = se * valid
    se_sum = masked_se.reshape(B, -1).sum(axis=1)
    cnt = jnp.maximum(valid.reshape(B, -1).sum(axis=1), 1.0)
    per = se_sum / cnt
    if reduction == "none":
        return per
    if reduction == "mean":
        return per.mean()
    return se_sum.sum() / jnp.maximum(cnt.sum(), 1.0)


if __name__ == "__main__":
    key = jax.random.PRNGKey(0)
    ok = True
    # Lane-aligned case, odd/padded spatial case, and multi-row-block case.
    for (B, H, W) in [(2, 16, 16), (5, 10, 13), (12, 16, 16)]:
        key, k_mask, k_out, k_tgt, k_stn = jax.random.split(key, 5)
        mask_2d = (jax.random.uniform(k_mask, (H, W)) > 0.3).astype(jnp.float32)
        output = jax.random.normal(k_out, (B, 1, H, W), dtype=jnp.float32)
        target = jax.random.normal(k_tgt, (B, 1, H, W), dtype=jnp.float32)
        station_mask = (jax.random.uniform(k_stn, (B, 1, H, W)) > 0.8
                        ).astype(jnp.float32)

        criterion = MaskedMSELoss(mask_2d)
        for red in ("none", "mean", "global"):
            got = jax.block_until_ready(
                criterion(output, target, station_mask, reduction=red))
            ref = _reference(mask_2d, output, target, station_mask, red)
            if not jnp.allclose(got, ref, rtol=1e-5, atol=1e-5):
                ok = False
                print(f"MISMATCH B={B} H={H} W={W} reduction={red}: "
                      f"{got} vs {ref}")

    if ok:
        print("KERNEL_OK")
</pallas_src>

<mosaic_0001>
module attributes {stable_mosaic.version = 11 : i64} {
  func.func @_masked_mse_kernel(%arg0: i32, %arg1: i32, %arg2: memref<1x256xf32, #tpu.memory_space<vmem>>, %arg3: memref<2x256xf32, #tpu.memory_space<vmem>>, %arg4: memref<2x256xf32, #tpu.memory_space<vmem>>, %arg5: memref<2x256xf32, #tpu.memory_space<vmem>>, %arg6: memref<2x1xf32, #tpu.memory_space<vmem>>, %arg7: memref<2x1xf32, #tpu.memory_space<vmem>>) attributes {dimension_semantics = [#tpu.dimension_semantics<parallel>, #tpu.dimension_semantics<arbitrary>], iteration_bounds = array<i64: 1, 1>, scalar_prefetch = 0 : i64, scratch_operands = 0 : i64, tpu.core_type = #tpu.core_type<tc>, window_params = [{transform_indices = @transform_0, window_bounds = array<i64: 1, 256>}, {transform_indices = @transform_1, window_bounds = array<i64: 2, 256>}, {transform_indices = @transform_2, window_bounds = array<i64: 2, 256>}, {transform_indices = @transform_3, window_bounds = array<i64: 2, 256>}, {transform_indices = @transform_4, window_bounds = array<i64: 2, 1>}, {transform_indices = @transform_5, window_bounds = array<i64: 2, 1>}]} {
    %c0_i32 = arith.constant 0 : i32
    %0 = arith.cmpi eq, %arg1, %c0_i32 : i32
    %1 = arith.extui %0 : i1 to i32
    %c0_i32_0 = arith.constant 0 : i32
    %2 = arith.cmpi ne, %1, %c0_i32_0 : i32
    scf.if %2 {
      %cst_19 = arith.constant 0.000000e+00 : f32
      %26 = vector.broadcast %cst_19 : f32 to vector<2x1xf32>
      %c0_20 = arith.constant 0 : index
      %c0_21 = arith.constant 0 : index
      %27 = vector.load %arg6[%c0_20, %c0_21] : memref<2x1xf32, #tpu.memory_space<vmem>>, vector<2x1xf32>
      tpu.vector_store %arg6[%c0_20, %c0_21], %26 {strides = array<i32>} : memref<2x1xf32, #tpu.memory_space<vmem>>, vector<2x1xf32>,
      %cst_22 = arith.constant 0.000000e+00 : f32
      %28 = vector.broadcast %cst_22 : f32 to vector<2x1xf32>
      %c0_23 = arith.constant 0 : index
      %c0_24 = arith.constant 0 : index
      %29 = vector.load %arg7[%c0_23, %c0_24] : memref<2x1xf32, #tpu.memory_space<vmem>>, vector<2x1xf32>
      tpu.vector_store %arg7[%c0_23, %c0_24], %28 {strides = array<i32>} : memref<2x1xf32, #tpu.memory_space<vmem>>, vector<2x1xf32>,
    } else {
    }
    %c0 = arith.constant 0 : index
    %c0_1 = arith.constant 0 : index
    %3 = vector.load %arg3[%c0, %c0_1] : memref<2x256xf32, #tpu.memory_space<vmem>>, vector<2x256xf32>
    %c0_2 = arith.constant 0 : index
    %c0_3 = arith.constant 0 : index
    %4 = vector.load %arg4[%c0_2, %c0_3] : memref<2x256xf32, #tpu.memory_space<vmem>>, vector<2x256xf32>
    %c0_4 = arith.constant 0 : index
    %c0_5 = arith.constant 0 : index
    %5 = vector.load %arg5[%c0_4, %c0_5] : memref<2x256xf32, #tpu.memory_space<vmem>>, vector<2x256xf32>
    %cst = arith.constant 0.000000e+00 : f32
    %6 = vector.broadcast %cst : f32 to vector<2x256xf32>
    %7 = arith.cmpf oeq, %5, %6 : vector<2x256xf32>
    %c0_6 = arith.constant 0 : index
    %c0_7 = arith.constant 0 : index
    %8 = vector.load %arg2[%c0_6, %c0_7] : memref<1x256xf32, #tpu.memory_space<vmem>>, vector<1x256xf32>
    %cst_8 = arith.constant 0.000000e+00 : f32
    %9 = vector.shape_cast %8 : vector<1x256xf32> to vector<1x256xf32>
    %10 = vector.broadcast %9 : vector<1x256xf32> to vector<2x256xf32>
    %11 = vector.broadcast %cst_8 : f32 to vector<2x256xf32>
    %12 = arith.select %7, %10, %11 : vector<2x256xi1>, vector<2x256xf32>
    %13 = arith.subf %3, %4 : vector<2x256xf32>
    %c0_9 = arith.constant 0 : index
    %c0_10 = arith.constant 0 : index
    %14 = vector.load %arg6[%c0_9, %c0_10] : memref<2x1xf32, #tpu.memory_space<vmem>>, vector<2x1xf32>
    %15 = arith.mulf %13, %13 : vector<2x256xf32>
    %16 = arith.mulf %15, %12 : vector<2x256xf32>
    %cst_11 = arith.constant dense<0.000000e+00> : vector<2xf32>
    %17 = vector.multi_reduction <add>, %16, %cst_11 [1] : vector<2x256xf32> to vector<2xf32>
    %18 = vector.shape_cast %17 : vector<2xf32> to vector<2x1xf32>
    %19 = arith.addf %14, %18 : vector<2x1xf32>
    %c0_12 = arith.constant 0 : index
    %c0_13 = arith.constant 0 : index
    %20 = vector.load %arg6[%c0_12, %c0_13] : memref<2x1xf32, #tpu.memory_space<vmem>>, vector<2x1xf32>
    tpu.vector_store %arg6[%c0_12, %c0_13], %19 {strides = array<i32>} : memref<2x1xf32, #tpu.memory_space<vmem>>, vector<2x1xf32>,
    %c0_14 = arith.constant 0 : index
    %c0_15 = arith.constant 0 : index
    %21 = vector.load %arg7[%c0_14, %c0_15] : memref<2x1xf32, #tpu.memory_space<vmem>>, vector<2x1xf32>
    %cst_16 = arith.constant dense<0.000000e+00> : vector<2xf32>
    %22 = vector.multi_reduction <add>, %12, %cst_16 [1] : vector<2x256xf32> to vector<2xf32>
    %23 = vector.shape_cast %22 : vector<2xf32> to vector<2x1xf32>
    %24 = arith.addf %21, %23 : vector<2x1xf32>
    %c0_17 = arith.constant 0 : index
    %c0_18 = arith.constant 0 : index
    %25 = vector.load %arg7[%c0_17, %c0_18] : memref<2x1xf32, #tpu.memory_space<vmem>>, vector<2x1xf32>
    tpu.vector_store %arg7[%c0_17, %c0_18], %24 {strides = array<i32>} : memref<2x1xf32, #tpu.memory_space<vmem>>, vector<2x1xf32>,
    return
  }
  func.func @transform_0(%arg0: i32, %arg1: i32) -> (i32, i32) {
    %c0_i32 = arith.constant 0 : i32
    %c0_i32_0 = arith.constant 0 : i32
    return %c0_i32, %arg1 : i32, i32
  }
  func.func @transform_1(%arg0: i32, %arg1: i32) -> (i32, i32) {
    %c0_i32 = arith.constant 0 : i32
    return %arg0, %arg1 : i32, i32
  }
  func.func @transform_2(%arg0: i32, %arg1: i32) -> (i32, i32) {
    %c0_i32 = arith.constant 0 : i32
    return %arg0, %arg1 : i32, i32
  }
  func.func @transform_3(%arg0: i32, %arg1: i32) -> (i32, i32) {
    %c0_i32 = arith.constant 0 : i32
    return %arg0, %arg1 : i32, i32
  }
  func.func @transform_4(%arg0: i32, %arg1: i32) -> (i32, i32) {
    %c0_i32 = arith.constant 0 : i32
    %c0_i32_0 = arith.constant 0 : i32
    return %arg0, %c0_i32 : i32, i32
  }
  func.func @transform_5(%arg0: i32, %arg1: i32) -> (i32, i32) {
    %c0_i32 = arith.constant 0 : i32
    %c0_i32_0 = arith.constant 0 : i32
    return %arg0, %c0_i32 : i32, i32
  }
}

</mosaic_0001>

<bundles_post_ra>
// kernel: tpu_custom_call.1
= control target key start
LH: loop header
LB: loop body
LE: loop exit
PB: predicated region body
PF: predicated region fallthrough
CT: control target
= control target key end

     0   :  { %11 = vsyncpa [#allocation3], 0  ;;  %s318_s0 = inlined_call_operand.hbm [shape: f32[1,256], index: 0, kind: input, shape index: {}]   ;;  %s319_s1 = inlined_call_operand.hbm [shape: f32[2,256], index: 1, kind: input, shape index: {}]   ;;  %s320_s2 = inlined_call_operand.hbm [shape: f32[2,256], index: 2, kind: input, shape index: {}]   ;;  %s321_s3 = inlined_call_operand.hbm [shape: f32[2,256], index: 3, kind: input, shape index: {}]   ;;  %s322_s4 = inlined_call_operand.vmem [shape: f32[2,1], index: 4, kind: output, shape index: {0}]   ;;  %s323_s5 = inlined_call_operand.vmem [shape: f32[2,1], index: 5, kind: output, shape index: {1}]  }
   0x1   :  { %12 = vsyncpa [#allocation5], 0  ;;  %s30_s20 = sshll.u32 %s319_s1, 4  ;;  %s31_s20 = int_to_ptr.hbm [resolvable:$true] %s30_s20 }
   0x2   :  { %13 = vsyncpa [#allocation8], 0  ;;  %s244_s21 = smov [#allocation4]   ;;  %s19_s25 = sshll.u32 %s318_s0, 4  ;;  %s20_s25 = int_to_ptr.hbm [resolvable:$true] %s19_s25 }
   0x3   :  { %s32_s22 = sshll.u32 %s244_s21, 4  ;;  %s245_s26 = smov [#allocation2]   ;;  %s33_s22 = int_to_ptr.vmem [resolvable:$true] %s32_s22 }
   0x4   :  { %35 = dma.hbm_to_vmem [thread:$0]  %s31_s20, 64, %s33_s22, [#allocation5]  }
   0x5   :  { %s21_s27 = sshll.u32 %s245_s26, 4  ;;  %s41_s30 = sshll.u32 %s320_s2, 4  ;;  %s22_s27 = int_to_ptr.vmem [resolvable:$true] %s21_s27  ;;  %s42_s30 = int_to_ptr.hbm [resolvable:$true] %s41_s30 }
   0x6   :  { %24 = dma.hbm_to_vmem [thread:$0]  %s20_s25, 32, %s22_s27, [#allocation3]  }
   0x7   :  { %s52_s7 = sshll.u32 %s321_s3, 4  ;;  %s246_s8 = smov [#allocation6]   ;;  %s53_s7 = int_to_ptr.hbm [resolvable:$true] %s52_s7 }
   0x8   :  { %s43_s9 = sshll.u32 %s246_s8, 4  ;;  %s247_s0 = smov [#allocation7]   ;;  %s44_s9 = int_to_ptr.vmem [resolvable:$true] %s43_s9 }
   0x9   :  { %46 = dma.hbm_to_vmem [thread:$0]  %s42_s30, 64, %s44_s9, [#allocation5]  }
   0xa   :  { %s54_s10 = sshll.u32 %s247_s0, 4  ;;  %s55_s10 = int_to_ptr.vmem [resolvable:$true] %s54_s10 }
   0xb   :  { %57 = dma.hbm_to_vmem [thread:$0]  %s53_s7, 64, %s55_s10, [#allocation8]  }
   0xc   :  { %238 = dma.done.wait [#allocation3], 32  }
   0xd   :  { %239 = vsyncadd [#allocation3], 4294967264 }
   0xe   :  { %240 = dma.done.wait [#allocation5], 128  }
   0xf   :  { %241 = vsyncadd [#allocation5], 4294967168 }
  0x10   :  { %242 = dma.done.wait [#allocation8], 64  }
  0x11   :  { %243 = vsyncadd [#allocation8], 4294967232  ;;  %vm78_vm0 = vcmask 1024   ;;  %v248_v0 = vmov 0.0   ;;  %v81_v1 = vld [vmem:[#allocation4] sm:$0xf] }
  0x12   :  { %79 = vst.msk [vmem:[%s322_s4] sm:$0x3] %vm78_vm0, %v248_v0  ;;  %v82_v2 = vld [vmem:[#allocation6] sm:$0xf]  ;;  %v83_v3 = vld [vmem:[#allocation7] sm:$0xf] }
  0x13   :  { %80 = vst.msk [vmem:[%s323_s5] sm:$0x3] %vm78_vm0, %v248_v0  ;;  %v85_v4 = vld [vmem:[#allocation2] sm:$0x3]  ;;  %v94_v5 = vsub.f32 %v81_v1, %v82_v2  ;;  %vm90_vm1 = vcmask 1041408   ;;  %vm84_vm2 = vcmp.eq.f32.partialorder %v83_v3, 0.0 }
  0x14   :  { %v87_v6 = vperm.slane %v85_v4, 0  ;;  %v88_v7 = vperm.slane %v85_v4, 1 }
  0x15   :  { %v96_v9 = vmul.f32 %v94_v5, %v94_v5 }
  0x16   :  { %v89_v8 = vrot.slane %v88_v7, 6 }
  0x18   :  { %v91_v10 = vsel %vm90_vm1, %v87_v6, %v89_v8 }
  0x19   :  { %v93_v11 = vsel %vm84_vm2, %v91_v10, 0.0  ;;  %v95_v23 = vld [vmem:[%s322_s4] sm:$0x3] }
  0x1a   :  { %v97_v12 = vmul.f32 %v96_v9, %v93_v11  ;;  %v112_v26 = vld [vmem:[%s323_s5] sm:$0x3] }
  0x1c   :  { %99 = vst [vmem:[#allocation1] ss:$4 sm:$0xff] %v97_v12 }
  0x23   :  { %v100_v13 = vld.sshfl [vmem:[#allocation1] sm:$0xff pattern:$0x73625140]  ;;  %v101_v14 = vld.sshfl [vmem:[#allocation1 + $0x8] sm:$0xff pattern:$0x73625140] }
  0x24   :  { %v104_v15 = vsel %vm90_vm1, %v100_v13, 0.0  ;;  %v105_v16 = vsel %vm90_vm1, %v101_v14, 0.0  ;;  %114 = vst [vmem:[#allocation1] ss:$4 sm:$0xff] %v93_v11 }
  0x25   :  { %v106_v17 = vadd.f32 %v105_v16, %v104_v15 }
  0x27   :  { %107 = vadd.xlane.f32.xlu0 %v106_v17 }
  0x2b   :  { %v115_v18 = vld.sshfl [vmem:[#allocation1] sm:$0xff pattern:$0x73625140]  ;;  %v116_v19 = vld.sshfl [vmem:[#allocation1 + $0x8] sm:$0xff pattern:$0x73625140] }
  0x2c   :  { %v119_v20 = vsel %vm90_vm1, %v115_v18, 0.0  ;;  %v120_v21 = vsel %vm90_vm1, %v116_v19, 0.0 }
  0x2d   :  { %v121_v22 = vadd.f32 %v120_v21, %v119_v20 }
  0x2f   :  { %122 = vadd.xlane.f32.xlu0 %v121_v22 }
  0x9a   :  { %v108_v24 = vpop.xlane.xlu0 %107 }
  0x9b   :  { %v109_v25 = vadd.f32 %v108_v24, %v95_v23 }
  0x9d   :  { %111 = vst.msk [vmem:[%s322_s4] sm:$0x3] %vm78_vm0, %v109_v25 }
  0xa2   :  { %v123_v27 = vpop.xlane.xlu0 %122 }
  0xa3   :  { %v124_v28 = vadd.f32 %v123_v27, %v112_v26 }
  0xa5   :  { %125 = vst.msk [vmem:[%s323_s5] sm:$0x3] %vm78_vm0, %v124_v28 }
  0xa6   :  { %134 = vsyncpa [#allocation3], 1 }
  0xa7   :  { %135 = vsyncpa [#allocation5], 1 }
  0xa8   :  { %136 = vsyncpa [#allocation8], 1 }

</bundles_post_ra>
